<compile_context>
chip_gen: v7x
topology: tpu7x:2x2x1
jax: 0.10.0
libtpu: 0.0.40
codegen_flags: <defaults>
</compile_context>

<pallas_src>
import math

import jax
import jax.numpy as jnp
from jax.experimental import pallas as pl
from jax.experimental.pallas import tpu as pltpu

_H = 64            # hidden width per head
_H2 = 2 * _H       # fused hidden width (policy | value)
_OUT_PAD = 128     # per-head padded output lane width (>= 21, multiple of 128)
_NEG = -1e30       # bias for padded policy lanes -> exp() underflows to 0


def _round_up(n, m):
    return ((n + m - 1) // m) * m


def _custom_network_kernel(x_ref, w1_ref, w2_ref, b_ref, out_ref):
    # x_ref : (bb, F)        fused W1 : (F, 128)     fused W2 : (128, 256)
    # b_ref : (1, 384) = [b1 (128) | b2 (256)]       out_ref  : (bb, 256)
    x = x_ref[...]
    b1 = b_ref[:, :_H2]
    b2 = b_ref[:, _H2:]

    # first layers of both heads in one lane-full matmul
    h = jnp.dot(x, w1_ref[...], preferred_element_type=jnp.float32) + b1
    h = jnp.maximum(h, 0.0)                                        # ReLU

    # second layers of both heads in one block-diagonal matmul -> lane-dense slab
    y = jnp.dot(h, w2_ref[...], preferred_element_type=jnp.float32) + b2

    logits = y[:, :_OUT_PAD]        # policy logits (padded lanes carry -1e30 bias)
    vf = y[:, _OUT_PAD:]            # value output (padded lanes are junk, sliced off)

    # numerically-stable softmax over the padded 128-lane block
    m = jnp.max(logits, axis=-1, keepdims=True)
    e = jnp.exp(logits - m)
    denom = jnp.sum(e, axis=-1, keepdims=True)
    pi = e * pl.reciprocal(denom, approx=True)                     # EUP vrcp

    out_ref[:, :_OUT_PAD] = pi
    out_ref[:, _OUT_PAD:] = vf


def custom_network_forward(features, fused, *, batch_block=256):
    """features: (B, F) float32. fused: dict from fuse_custom_network_params."""
    B, F = features.shape
    n_pi = fused["n_pi"]
    n_vf = fused["n_vf"]

    # pad batch to a sublane-friendly multiple of 8, grid over batch blocks
    bb = min(batch_block, _round_up(B, 8))
    B_pad = _round_up(B, bb)
    if B_pad != B:
        features = jnp.pad(features, ((0, B_pad - B), (0, 0)))
    grid = (B_pad // bb,)

    out = pl.pallas_call(
        _custom_network_kernel,
        out_shape=jax.ShapeDtypeStruct((B_pad, 2 * _OUT_PAD), jnp.float32),
        grid=grid,
        in_specs=[
            pl.BlockSpec((bb, F), lambda i: (i, 0)),            # x
            pl.BlockSpec((F, _H2), lambda i: (0, 0)),           # fused W1
            pl.BlockSpec((_H2, 2 * _OUT_PAD), lambda i: (0, 0)),  # fused W2
            pl.BlockSpec((1, _H2 + 2 * _OUT_PAD), lambda i: (0, 0)),  # packed biases
        ],
        out_specs=pl.BlockSpec((bb, 2 * _OUT_PAD), lambda i: (i, 0)),
        compiler_params=pltpu.CompilerParams(
            dimension_semantics=("parallel",)),
    )(features, fused["w1"], fused["w2"], fused["b"])

    # layout plumbing in the wrapper: slice the lane-dense slab back to real dims
    latent_pi = out[:B, :n_pi]
    latent_vf = out[:B, _OUT_PAD:_OUT_PAD + n_vf]
    return latent_pi, latent_vf


# ----------------------------- parameter handling -----------------------------

def _xavier_uniform(key, fan_in, fan_out):
    # matches nn.init.xavier_uniform_ (gain=1); stored as (in, out)
    bound = math.sqrt(6.0 / (fan_in + fan_out))
    return jax.random.uniform(key, (fan_in, fan_out), jnp.float32, -bound, bound)


def _linear_bias(key, fan_in, fan_out):
    # PyTorch Linear default bias init: U(-1/sqrt(fan_in), 1/sqrt(fan_in))
    bound = 1.0 / math.sqrt(fan_in)
    return jax.random.uniform(key, (1, fan_out), jnp.float32, -bound, bound)


def init_custom_network_params(key, feature_dim, last_layer_dim_pi=21, last_layer_dim_vf=21):
    ks = jax.random.split(key, 8)
    return {
        # policy net
        "w1p": _xavier_uniform(ks[0], feature_dim, _H),
        "b1p": _linear_bias(ks[1], feature_dim, _H),
        "w2p": _xavier_uniform(ks[2], _H, last_layer_dim_pi),
        "b2p": _linear_bias(ks[3], _H, last_layer_dim_pi),
        # value net
        "w1v": _xavier_uniform(ks[4], feature_dim, _H),
        "b1v": _linear_bias(ks[5], feature_dim, _H),
        "w2v": _xavier_uniform(ks[6], _H, last_layer_dim_vf),
        "b2v": _linear_bias(ks[7], _H, last_layer_dim_vf),
    }


def fuse_custom_network_params(params):
    """Host-side (one-time) fusion of the two heads into lane-full weights."""
    F = params["w1p"].shape[0]
    n_pi = params["w2p"].shape[1]
    n_vf = params["w2v"].shape[1]
    assert n_pi <= _OUT_PAD and n_vf <= _OUT_PAD

    # layer-1: concat along out dim -> (F, 128), (1, 128)
    w1 = jnp.concatenate([params["w1p"], params["w1v"]], axis=1)
    b1 = jnp.concatenate([params["b1p"], params["b1v"]], axis=1)

    # layer-2: block-diagonal, each head padded to 128 lanes -> (128, 256)
    w2 = jnp.zeros((_H2, 2 * _OUT_PAD), jnp.float32)
    w2 = w2.at[:_H, :n_pi].set(params["w2p"])
    w2 = w2.at[_H:, _OUT_PAD:_OUT_PAD + n_vf].set(params["w2v"])

    b2 = jnp.zeros((1, 2 * _OUT_PAD), jnp.float32)
    b2 = b2.at[:, n_pi:_OUT_PAD].set(_NEG)          # mask padded policy lanes
    b2 = b2.at[:, :n_pi].set(params["b2p"])
    b2 = b2.at[:, _OUT_PAD:_OUT_PAD + n_vf].set(params["b2v"])

    b_all = jnp.concatenate([b1, b2], axis=1)       # (1, 384)
    return {"w1": w1, "w2": w2, "b": b_all, "n_pi": n_pi, "n_vf": n_vf}


def _reference_forward(features, params):
    # plain-JAX reference (matches the PyTorch module) for a correctness check
    h = jnp.maximum(features @ params["w1p"] + params["b1p"], 0.0)
    logits = h @ params["w2p"] + params["b2p"]
    pi = jax.nn.softmax(logits, axis=-1)
    hv = jnp.maximum(features @ params["w1v"] + params["b1v"], 0.0)
    vf = hv @ params["w2v"] + params["b2v"]
    return pi, vf


if __name__ == "__main__":
    key = jax.random.PRNGKey(0)
    k_feat, k_param = jax.random.split(key)

    batch = 2
    feature_dim = 32       # "features extracted by the features extractor"
    features = jax.random.normal(k_feat, (batch, feature_dim), jnp.float32)

    params = init_custom_network_params(k_param, feature_dim,
                                        last_layer_dim_pi=21,
                                        last_layer_dim_vf=21)
    fused = fuse_custom_network_params(params)

    latent_pi, latent_vf = custom_network_forward(features, fused)
    jax.block_until_ready((latent_pi, latent_vf))

    ref_pi, ref_vf = _reference_forward(features, params)
    assert latent_pi.shape == (batch, 21) and latent_vf.shape == (batch, 21)
    # value head is exact math (block-diag just adds zeros into the f32 accumulate)
    assert jnp.allclose(latent_vf, ref_vf, atol=1e-4, rtol=1e-4)
    # policy head uses the EUP approximate reciprocal -> slightly looser tolerance
    assert jnp.allclose(latent_pi, ref_pi, atol=2e-3, rtol=2e-3)
    # softmax rows sum to ~1
    assert jnp.allclose(jnp.sum(latent_pi, axis=-1), 1.0, atol=2e-3)

    print("KERNEL_OK")
</pallas_src>

<mosaic_0001>
module attributes {stable_mosaic.version = 11 : i64} {
  func.func @_custom_network_kernel(%arg0: i32, %arg1: memref<8x32xf32, #tpu.memory_space<vmem>>, %arg2: memref<32x128xf32, #tpu.memory_space<vmem>>, %arg3: memref<128x256xf32, #tpu.memory_space<vmem>>, %arg4: memref<1x384xf32, #tpu.memory_space<vmem>>, %arg5: memref<8x256xf32, #tpu.memory_space<vmem>>) attributes {dimension_semantics = [#tpu.dimension_semantics<parallel>], iteration_bounds = array<i64: 1>, scalar_prefetch = 0 : i64, scratch_operands = 0 : i64, tpu.core_type = #tpu.core_type<tc>, window_params = [{transform_indices = @transform_0, window_bounds = array<i64: 8, 32>}, {pipeline_mode = #tpu.pipeline_mode<synchronous>, transform_indices = @transform_1, window_bounds = array<i64: 32, 128>}, {pipeline_mode = #tpu.pipeline_mode<synchronous>, transform_indices = @transform_2, window_bounds = array<i64: 128, 256>}, {pipeline_mode = #tpu.pipeline_mode<synchronous>, transform_indices = @transform_3, window_bounds = array<i64: 1, 384>}, {transform_indices = @transform_4, window_bounds = array<i64: 8, 256>}]} {
    %c0 = arith.constant 0 : index
    %c0_0 = arith.constant 0 : index
    %0 = vector.load %arg1[%c0, %c0_0] : memref<8x32xf32, #tpu.memory_space<vmem>>, vector<8x32xf32>
    %c0_1 = arith.constant 0 : index
    %c0_2 = arith.constant 0 : index
    %1 = vector.load %arg4[%c0_1, %c0_2] : memref<1x384xf32, #tpu.memory_space<vmem>>, vector<1x128xf32>
    %c0_3 = arith.constant 0 : index
    %c128 = arith.constant 128 : index
    %2 = vector.load %arg4[%c0_3, %c128] : memref<1x384xf32, #tpu.memory_space<vmem>>, vector<1x256xf32>
    %c0_4 = arith.constant 0 : index
    %c0_5 = arith.constant 0 : index
    %3 = vector.load %arg2[%c0_4, %c0_5] : memref<32x128xf32, #tpu.memory_space<vmem>>, vector<32x128xf32>
    %cst = arith.constant dense<0.000000e+00> : vector<8x128xf32>
    %4 = tpu.matmul %0, %3, %cst {dimension_numbers = #tpu.dot_dimension_numbers<[1], [0], [0], [1], [0, 0, 1, 1], [], []>} : vector<8x32xf32>, vector<32x128xf32>, vector<8x128xf32> -> vector<8x128xf32>
    %5 = vector.broadcast %1 : vector<1x128xf32> to vector<8x128xf32>
    %6 = arith.addf %4, %5 : vector<8x128xf32>
    %cst_6 = arith.constant 0.000000e+00 : f32
    %7 = vector.broadcast %cst_6 : f32 to vector<8x128xf32>
    %8 = arith.maximumf %6, %7 : vector<8x128xf32>
    %c0_7 = arith.constant 0 : index
    %c0_8 = arith.constant 0 : index
    %9 = vector.load %arg3[%c0_7, %c0_8] : memref<128x256xf32, #tpu.memory_space<vmem>>, vector<128x256xf32>
    %cst_9 = arith.constant dense<0.000000e+00> : vector<8x256xf32>
    %10 = tpu.matmul %8, %9, %cst_9 {dimension_numbers = #tpu.dot_dimension_numbers<[1], [0], [0], [1], [0, 0, 1, 1], [], []>} : vector<8x128xf32>, vector<128x256xf32>, vector<8x256xf32> -> vector<8x256xf32>
    %11 = vector.broadcast %2 : vector<1x256xf32> to vector<8x256xf32>
    %12 = arith.addf %10, %11 : vector<8x256xf32>
    %13 = vector.extract_strided_slice %12 {offsets = [0, 0], sizes = [8, 128], strides = [1, 1]} : vector<8x256xf32> to vector<8x128xf32>
    %14 = vector.extract_strided_slice %12 {offsets = [0, 128], sizes = [8, 128], strides = [1, 1]} : vector<8x256xf32> to vector<8x128xf32>
    %cst_10 = arith.constant dense<0xFF800000> : vector<8xf32>
    %15 = vector.multi_reduction <maximumf>, %13, %cst_10 [1] : vector<8x128xf32> to vector<8xf32>
    %16 = vector.shape_cast %15 : vector<8xf32> to vector<8x1xf32>
    %17 = vector.broadcast %16 : vector<8x1xf32> to vector<8x128xf32>
    %18 = arith.subf %13, %17 : vector<8x128xf32>
    %19 = math.exp %18 : vector<8x128xf32>
    %cst_11 = arith.constant dense<0.000000e+00> : vector<8xf32>
    %20 = vector.multi_reduction <add>, %19, %cst_11 [1] : vector<8x128xf32> to vector<8xf32>
    %21 = vector.shape_cast %20 : vector<8xf32> to vector<8x1xf32>
    %22 = tpu.reciprocal %21 {approx = true} : vector<8x1xf32> -> vector<8x1xf32>
    %23 = vector.broadcast %22 : vector<8x1xf32> to vector<8x128xf32>
    %24 = arith.mulf %19, %23 : vector<8x128xf32>
    %c0_12 = arith.constant 0 : index
    %c0_13 = arith.constant 0 : index
    %25 = vector.load %arg5[%c0_12, %c0_13] : memref<8x256xf32, #tpu.memory_space<vmem>>, vector<8x128xf32>
    tpu.vector_store %arg5[%c0_12, %c0_13], %24 {strides = array<i32>} : memref<8x256xf32, #tpu.memory_space<vmem>>, vector<8x128xf32>,
    %c0_14 = arith.constant 0 : index
    %c128_15 = arith.constant 128 : index
    %26 = vector.load %arg5[%c0_14, %c128_15] : memref<8x256xf32, #tpu.memory_space<vmem>>, vector<8x128xf32>
    tpu.vector_store %arg5[%c0_14, %c128_15], %14 {strides = array<i32>} : memref<8x256xf32, #tpu.memory_space<vmem>>, vector<8x128xf32>,
    return
  }
  func.func @transform_0(%arg0: i32) -> (i32, i32) {
    %c0_i32 = arith.constant 0 : i32
    %c0_i32_0 = arith.constant 0 : i32
    return %arg0, %c0_i32 : i32, i32
  }
  func.func @transform_1(%arg0: i32) -> (i32, i32) {
    %c0_i32 = arith.constant 0 : i32
    %c0_i32_0 = arith.constant 0 : i32
    %c0_i32_1 = arith.constant 0 : i32
    return %c0_i32, %c0_i32_0 : i32, i32
  }
  func.func @transform_2(%arg0: i32) -> (i32, i32) {
    %c0_i32 = arith.constant 0 : i32
    %c0_i32_0 = arith.constant 0 : i32
    %c0_i32_1 = arith.constant 0 : i32
    return %c0_i32, %c0_i32_0 : i32, i32
  }
  func.func @transform_3(%arg0: i32) -> (i32, i32) {
    %c0_i32 = arith.constant 0 : i32
    %c0_i32_0 = arith.constant 0 : i32
    %c0_i32_1 = arith.constant 0 : i32
    return %c0_i32, %c0_i32_0 : i32, i32
  }
  func.func @transform_4(%arg0: i32) -> (i32, i32) {
    %c0_i32 = arith.constant 0 : i32
    %c0_i32_0 = arith.constant 0 : i32
    return %arg0, %c0_i32 : i32, i32
  }
}

</mosaic_0001>

<bundles_post_ra>
// kernel: tpu_custom_call.1
= control target key start
LH: loop header
LB: loop body
LE: loop exit
PB: predicated region body
PF: predicated region fallthrough
CT: control target
= control target key end

     0   :  { %9 = vsyncpa [#allocation3], 0  ;;  %s541_s0 = inlined_call_operand.hbm [shape: f32[8,32], index: 0, kind: input, shape index: {}]   ;;  %s542_s1 = inlined_call_operand.hbm [shape: f32[32,128], index: 1, kind: input, shape index: {}]   ;;  %s543_s2 = inlined_call_operand.hbm [shape: f32[128,256], index: 2, kind: input, shape index: {}]   ;;  %s544_s3 = inlined_call_operand.vmem [shape: f32[1,384], index: 3, kind: input, shape index: {}]   ;;  %s545_s4 = inlined_call_operand.hbm [shape: f32[8,256], index: 4, kind: output, shape index: {}]  }
   0x1   :  { %10 = vsyncpa [#allocation6], 0 }
   0x2   :  { %11 = vsyncpa [#allocation4], 0  ;;  %s451_s15 = smov [#allocation5]   ;;  %s357_s19 = scalar_lea.hbm %s542_s1, 512 }
   0x3   :  { %s27_s16 = sshll.u32 %s451_s15, 4  ;;  %p358_p0 = scmp.ne.s32.totalorder %s542_s1, %s357_s19  ;;  %s28_s16 = int_to_ptr.vmem [resolvable:$true] %s27_s16 }
   0x4   :  { %p361_p1 = scmp.lt.u32.totalorder %s357_s19, %s542_s1 }
   0x6   :  { %p363_p2 = pnand %p361_p1, %p358_p0 }
   0x8   :  { %366 = shalt.err (!%p363_p2)
}
   0x9   :  { %s367_s24 = scalar_lea.vmem %s28_s16, 512  ;;  %p372_p4 = scmp.lt.s32.totalorder %s28_s16, %s28_s16 }
   0xa   :  { %p368_p3 = scmp.ne.s32.totalorder %s28_s16, %s367_s24  ;;  %p373_p5 = scmp.lt.s32.totalorder %s367_s24, %s367_s24 }
   0xc   :  { %p374_p6 = por %p373_p5, %p372_p4 }
   0xe   :  { %p375_p7 = pnand %p374_p6, %p368_p3 }
  0x10   :  { %378 = shalt.err (!%p375_p7)
}
  0x11   :  { %s452_s25 = smov 128   ;;  %s453_s26 = smov 8  }
  0x12   :  { %33 = dma.hbm_to_vmem [thread:$0]  %s542_s1, 512, %s28_s16, [#allocation6], %s452_s25, %s452_s25, %s453_s26  }
  0x13   :  { %s454_s29 = smov [#allocation2]   ;;  %s455_s5 = smov [#allocation7]  }
  0x14   :  { %s18_s30 = sshll.u32 %s454_s29, 4  ;;  %s39_s6 = sshll.u32 %s455_s5, 4  ;;  %s19_s30 = int_to_ptr.vmem [resolvable:$true] %s18_s30  ;;  %s40_s6 = int_to_ptr.vmem [resolvable:$true] %s39_s6 }
  0x15   :  { %s379_s9 = scalar_lea.hbm %s541_s0, 128 }
  0x16   :  { %p380_p8 = scmp.ne.s32.totalorder %s541_s0, %s379_s9  ;;  %p383_p9 = scmp.lt.u32.totalorder %s379_s9, %s541_s0 }
  0x18   :  { %p385_p10 = pnand %p383_p9, %p380_p8 }
  0x1a   :  { %388 = shalt.err (!%p385_p10)
}
  0x1b   :  { %s389_s1 = scalar_lea.vmem %s19_s30, 128  ;;  %p394_p12 = scmp.lt.s32.totalorder %s19_s30, %s19_s30 }
  0x1c   :  { %p390_p11 = scmp.ne.s32.totalorder %s19_s30, %s389_s1  ;;  %p395_p13 = scmp.lt.s32.totalorder %s389_s1, %s389_s1 }
  0x1e   :  { %p396_p0 = por %p395_p13, %p394_p12 }
  0x20   :  { %p397_p1 = pnand %p396_p0, %p390_p11 }
  0x22   :  { %400 = shalt.err (!%p397_p1)
}
  0x23   :  { %21 = dma.hbm_to_vmem [thread:$0]  %s541_s0, 128, %s19_s30, [#allocation3]  }
  0x24   :  { %s401_s18 = scalar_lea.hbm %s543_s2, 4096 }
  0x25   :  { %p402_p2 = scmp.ne.s32.totalorder %s543_s2, %s401_s18  ;;  %p405_p3 = scmp.lt.u32.totalorder %s401_s18, %s543_s2 }
  0x27   :  { %p407_p4 = pnand %p405_p3, %p402_p2 }
  0x29   :  { %410 = shalt.err (!%p407_p4)
}
  0x2a   :  { %s411_s23 = scalar_lea.vmem %s40_s6, 4096  ;;  %p416_p6 = scmp.lt.s32.totalorder %s40_s6, %s40_s6 }
  0x2b   :  { %p412_p5 = scmp.ne.s32.totalorder %s40_s6, %s411_s23  ;;  %p417_p7 = scmp.lt.s32.totalorder %s411_s23, %s411_s23 }
  0x2d   :  { %p418_p8 = por %p417_p7, %p416_p6 }
  0x2f   :  { %p419_p9 = pnand %p418_p8, %p412_p5 }
  0x31   :  { %422 = shalt.err (!%p419_p9)
}
  0x32   :  { %s456_s0 = smov 256   ;;  %s457_s24 = smov 16  }
  0x33   :  { %45 = dma.hbm_to_vmem [thread:$0]  %s543_s2, 4096, %s40_s6, [#allocation6], %s456_s0, %s456_s0, %s457_s24  }
  0x34   :  { %445 = dma.done.wait [#allocation3], 128  }
  0x35   :  { %446 = vsyncadd [#allocation3], 4294967168 }
  0x36   :  { %447 = dma.done.wait [#allocation6], 4608  }
  0x37   :  { %448 = vsyncadd [#allocation6], 4294962688  ;;  %v458_v0 = vmov 0.0|0.0   ;;  %vm459_vm0 = vmmov 0   ;;  %v460_v1 = vmov 0.0   ;;  %v60_v2 = vld [vmem:[#allocation5] sm:$0xff]  ;;  %v178_v62 = vlaneseq }
  0x38   :  { %304 = vmatprep.subr.bf16.mxu0 %v458_v0  ;;  %301 = vmatprep.mubr.msk.f32.mxu0 %vm459_vm0, %v460_v1  ;;  %v61_v3 = vld [vmem:[#allocation5 + $0x8] sm:$0xff]  ;;  %v62_v4 = vld [vmem:[#allocation5 + $0x10] sm:$0xff]  ;;  %v63_v6 = vld [vmem:[#allocation5 + $0x18] sm:$0xff]  ;;  %vm70_vm1 = vcmask 261120   ;;  %s461_s30 = smov [#allocation8]  }
  0x39   :  { %252 = vmatprep.mubr.f32.mxu1 %v460_v1  ;;  %v305_v5 = vpack.c.bf16 %v61_v3, %v60_v2  ;;  %v146_v7 = vld [vmem:[#allocation7 + $0x8] sm:$0xff]  ;;  %v148_v8 = vld [vmem:[#allocation7 + $0x18] sm:$0xff]  ;;  %v145_v9 = vld [vmem:[#allocation7] sm:$0xff]  ;;  %v308_v11 = vpack.c.bf16 %v63_v6, %v62_v4  ;;  %v179_v63 = vshrl.u32 %v178_v62, 7  ;;  %s276_s5 = sshll.u32 %s461_s30, 4  ;;  %s277_s5 = int_to_ptr.vmem [resolvable:$true] %s276_s5 }
  0x3a   :  { %v147_v10 = vld [vmem:[#allocation7 + $0x10] sm:$0xff]  ;;  %v310_v12 = vpack.c.bf16 %v148_v8, %v146_v7  ;;  %v150_v14 = vld [vmem:[#allocation7 + $0x28] sm:$0xff]  ;;  %v152_v15 = vld [vmem:[#allocation7 + $0x38] sm:$0xff]  ;;  %p428_p11 = scmp.lt.s32.totalorder %s277_s5, %s277_s5 }
  0x3b   :  { %306 = vmatpush3.bf16.msra.mxu0 %v305_v5  ;;  %v312_v13 = vpack.c.bf16 %v147_v10, %v145_v9  ;;  %v149_v16 = vld [vmem:[#allocation7 + $0x20] sm:$0xff]  ;;  %v314_v17 = vpack.c.bf16 %v152_v15, %v150_v14  ;;  %v151_v18 = vld [vmem:[#allocation7 + $0x30] sm:$0xff]  ;;  %v154_v19 = vld [vmem:[#allocation7 + $0x48] sm:$0xff]  ;;  %v184_v2 = vsub.s32 1, %v179_v63 }
  0x3c   :  { %307 = vmatprep.subr.bf16.mxu0 %v458_v0  ;;  %v156_v20 = vld [vmem:[#allocation7 + $0x58] sm:$0xff]  ;;  %311 = vmatprep.subr.bf16.mxu1 %v310_v12  ;;  %v316_v21 = vpack.c.bf16 %v151_v18, %v149_v16  ;;  %v153_v24 = vld [vmem:[#allocation7 + $0x40] sm:$0xff]  ;;  %v155_v25 = vld [vmem:[#allocation7 + $0x50] sm:$0xff]  ;;  %v180_v0 = vsub.s32 0, %v179_v63 }
  0x3d   :  { %313 = vmatpush1.bf16.msra.mxu1 %v312_v13  ;;  %v57_v22 = vld [vmem:[#allocation2] sm:$0xff]  ;;  %v318_v23 = vpack.c.bf16 %v156_v20, %v154_v19  ;;  %v158_v26 = vld [vmem:[#allocation7 + $0x68] sm:$0xff]  ;;  %v320_v28 = vpack.c.bf16 %v155_v25, %v153_v24  ;;  %v157_v30 = vld [vmem:[#allocation7 + $0x60] sm:$0xff] }
  0x3e   :  { %315 = vmatprep.subr.bf16.mxu1 %v314_v17  ;;  %v160_v27 = vld [vmem:[#allocation7 + $0x78] sm:$0xff]  ;;  %v159_v31 = vld [vmem:[#allocation7 + $0x70] sm:$0xff]  ;;  %v162_v32 = vld [vmem:[#allocation7 + $0x88] sm:$0xff] }
  0x3f   :  { %309 = vmatpush3.bf16.msra.mxu0 %v308_v11  ;;  %v322_v29 = vpack.c.bf16 %v160_v27, %v158_v26  ;;  %v164_v33 = vld [vmem:[#allocation7 + $0x98] sm:$0xff]  ;;  %v324_v34 = vpack.c.bf16 %v159_v31, %v157_v30  ;;  %v161_v36 = vld [vmem:[#allocation7 + $0x80] sm:$0xff]  ;;  %v163_v37 = vld [vmem:[#allocation7 + $0x90] sm:$0xff] }
  0x40   :  { %v326_v35 = vpack.c.bf16 %v164_v33, %v162_v32  ;;  %v166_v38 = vld [vmem:[#allocation7 + $0xa8] sm:$0xff]  ;;  %v168_v39 = vld [vmem:[#allocation7 + $0xb8] sm:$0xff]  ;;  %v328_v40 = vpack.c.bf16 %v163_v37, %v161_v36  ;;  %v165_v42 = vld [vmem:[#allocation7 + $0xa0] sm:$0xff] }
  0x41   :  { %317 = vmatpush1.bf16.msra.mxu1 %v316_v21  ;;  %v330_v41 = vpack.c.bf16 %v168_v39, %v166_v38  ;;  %v167_v43 = vld [vmem:[#allocation7 + $0xb0] sm:$0xff]  ;;  %v170_v44 = vld [vmem:[#allocation7 + $0xc8] sm:$0xff]  ;;  %v172_v45 = vld [vmem:[#allocation7 + $0xd8] sm:$0xff] }
  0x42   :  { %302 = vmatmul.mubr.msk.f32.vlgmr.msra.gmra.mrb[0].mxu0 %vm70_vm1, %v57_v22  ;;  %319 = vmatprep.subr.bf16.mxu1 %v318_v23  ;;  %v332_v46 = vpack.c.bf16 %v167_v43, %v165_v42  ;;  %v334_v47 = vpack.c.bf16 %v172_v45, %v170_v44  ;;  %v169_v48 = vld [vmem:[#allocation7 + $0xc0] sm:$0xff]  ;;  %v171_v49 = vld [vmem:[#allocation7 + $0xd0] sm:$0xff]  ;;  %v174_v51 = vld [vmem:[#allocation7 + $0xe8] sm:$0xff] }
  0x43   :  { %v336_v50 = vpack.c.bf16 %v171_v49, %v169_v48  ;;  %v176_v52 = vld [vmem:[#allocation7 + $0xf8] sm:$0xff]  ;;  %v173_v54 = vld [vmem:[#allocation7 + $0xe0] sm:$0xff]  ;;  %v175_v55 = vld [vmem:[#allocation7 + $0xf0] sm:$0xff] }
  0x44   :  { %v338_v53 = vpack.c.bf16 %v176_v52, %v174_v51  ;;  %v340_v56 = vpack.c.bf16 %v175_v55, %v173_v54  ;;  %v286_v57 = vld [vmem:[%s544_s3] ss:$0 sm:$0xff]  ;;  %v59_v1 = vld [vmem:[%s544_s3 + $0x1] sm:$0x3]  ;;  %s423_s3 = scalar_lea.vmem %s277_s5, 256 }
  0x45   :  { %321 = vmatpush1.bf16.msra.mxu1 %v320_v28  ;;  %v181_v3 = vrot.slane %v59_v1, %v180_v0  ;;  %v185_v4 = vrot.slane %v59_v1, %v184_v2  ;;  %p424_p10 = scmp.ne.s32.totalorder %s277_s5, %s423_s3  ;;  %p429_p12 = scmp.lt.s32.totalorder %s423_s3, %s423_s3 }
  0x46   :  { %323 = vmatprep.subr.bf16.mxu1 %v322_v29 }
  0x47   :  { %p430_p13 = por %p429_p12, %p428_p11 }
  0x49   :  { %325 = vmatpush1.bf16.msra.mxu1 %v324_v34  ;;  %p431_p0 = pnand %p430_p13, %p424_p10 }
  0x4a   :  { %327 = vmatprep.subr.bf16.mxu1 %v326_v35 }
  0x4d   :  { %329 = vmatpush1.bf16.msra.mxu1 %v328_v40 }
  0x4e   :  { %331 = vmatprep.subr.bf16.mxu1 %v330_v41 }
  0x51   :  { %333 = vmatpush1.bf16.msra.mxu1 %v332_v46 }
  0x52   :  { %335 = vmatprep.subr.bf16.mxu1 %v334_v47 }
  0x55   :  { %337 = vmatpush1.bf16.msra.mxu1 %v336_v50 }
  0x56   :  { %339 = vmatprep.subr.bf16.mxu1 %v338_v53 }
  0x59   :  { %341 = vmatpush1.bf16.msra.mxu1 %v340_v56 }
 0x115   :  { %v140_v58 = vpop.f32.mrb[0].mxu0 }
 0x116   :  { %v141_v59 = vadd.f32 %v286_v57, %v140_v58  ;;  %v303_v60 = vpop.f32.mrb[1].mxu0 }
 0x118   :  { %v144_v61 = vmax.f32 %v141_v59, 0.0 }
 0x11a   :  { %253 = vmatmul.mubr.f32.vlgmr.msra.gmra.mrb[0].mxu1 %v144_v61 }
 0x1ed   :  { %v254_v5 = vpop.f32.mrb[0].mxu1 }
 0x1ee   :  { %v255_v6 = vadd.f32 %v254_v5, %v181_v3  ;;  %v256_v7 = vpop.f32.mrb[1].mxu1 }
 0x1ef   :  { %v257_v8 = vadd.f32 %v256_v7, %v185_v4 }
 0x1f0   :  { %259 = vmax.xlane.f32.xlu0 %v255_v6 }
 0x1f1   :  { %269 = vst [vmem:[#allocation8 + $0x8] sm:$0xff] %v257_v8 }
 0x27d   :  { %v260_v9 = vpop.xlane.xlu0 %259 }
 0x27e   :  { %v261_v10 = vsub.f32 %v255_v6, %v260_v9 }
 0x280   :  { %v262_v11 = vmul.f32 1.442695, %v261_v10 }
 0x282   :  { %353 = vpow2.f32 %v262_v11 }
 0x28c   :  { %v354_v12 = vpop.eup %353 }
 0x28d   :  { %264 = vadd.xlane.f32.xlu0 %v354_v12 }
 0x31a   :  { %v265_v13 = vpop.xlane.xlu0 %264 }
 0x31b   :  { %355 = vrcp.f32 %v265_v13 }
 0x325   :  { %v356_v14 = vpop.eup %355 }
 0x326   :  { %v267_v15 = vmul.f32 %v356_v14, %v354_v12 }
 0x328   :  { %268 = vst [vmem:[#allocation8] sm:$0xff] %v267_v15 }
 0x329   :  { %434 = shalt.err (!%p431_p0)
}
 0x32a   :  { %s435_s8 = scalar_lea.hbm %s545_s4, 256 }
 0x32b   :  { %p436_p1 = scmp.ne.s32.totalorder %s545_s4, %s435_s8  ;;  %p439_p2 = scmp.lt.u32.totalorder %s435_s8, %s545_s4 }
 0x32d   :  { %p441_p3 = pnand %p439_p2, %p436_p1 }
 0x32f   :  { %444 = shalt.err (!%p441_p3)
}
 0x330   :  { %279 = dma.vmem_to_hbm [thread:$0]  %s277_s5, 256, %s545_s4, [#allocation4]  }
 0x331   :  { %449 = dma.done.wait [#allocation4], 256  }
 0x332   :  { %450 = vsyncadd [#allocation4], 4294967040 }
 0x333   :  { %283 = vsyncpa [#allocation3], 1 }
 0x334   :  { %284 = vsyncpa [#allocation6], 1 }
 0x335   :  { %285 = vsyncpa [#allocation4], 1 }

</bundles_post_ra>
